<compile_context>
chip_gen: v6e
topology: v6e:2x2x1
jax: 0.10.0
libtpu: 0.0.40
codegen_flags: <defaults>
</compile_context>

<pallas_src>
import functools

import jax
import jax.numpy as jnp
from jax import lax
from jax.experimental import pallas as pl
from jax.experimental.pallas import tpu as pltpu

EPS = 1e-5


def _conv_bn_relu_kernel(x_ref, w_ref, bias_ref, gamma_ref, beta_ref, cmean_ref,
                         out_ref, *, H):
    """Fused 3x3 'same' conv + training-mode BatchNorm2d + ReLU.

    x_ref:     (N*H, W*Cin)         input, NHWC with (W, Cin) flattened on lanes
    w_ref:     (KH, W*Cin, W*Cout)  band weight slabs (kw taps + W-pad folded in)
    bias_ref:  (1, W*Cout)          conv bias, tiled over w
    gamma_ref: (1, W*Cout)          BN weight, tiled over w
    beta_ref:  (1, W*Cout)          BN bias, tiled over w
    cmean_ref: (W*Cout, W*Cout)     per-channel sum / (N*H*W) broadcast matrix
    out_ref:   (N*H, W*Cout)
    """
    NH = x_ref.shape[0]
    KH = w_ref.shape[0]
    WCout = w_ref.shape[2]

    x2d = x_ref[...]                                            # (N*H, W*Cin)
    row = lax.broadcasted_iota(jnp.int32, (NH, 1), 0) % H       # row-within-image

    # 3x3 conv as KH lane-dense MXU matmuls (contraction = W*Cin).
    acc = jnp.zeros((NH, WCout), jnp.float32)
    for kh in range(KH):
        d = kh - KH // 2                                        # row offset of tap
        if d == 0:
            lhs = x2d
        else:
            shifted = pltpu.roll(x2d, (-d) % NH, axis=0)        # row r <- row r+d
            valid = (row >= -d) if d < 0 else (row < H - d)     # zero-pad H edges
            lhs = jnp.where(valid, shifted, 0.0)
        acc = acc + jnp.dot(lhs, w_ref[kh], preferred_element_type=jnp.float32)

    acc = acc + bias_ref[...]

    # BatchNorm2d training-mode forward: per-channel batch mean / biased var.
    # Channels live on lanes with stride Cout; the cross-lane reduce + broadcast
    # is a single tiny matmul against the precomputed cmean matrix.
    mean = jnp.dot(jnp.sum(acc, axis=0, keepdims=True), cmean_ref[...],
                   preferred_element_type=jnp.float32)
    centered = acc - mean
    var = jnp.dot(jnp.sum(centered * centered, axis=0, keepdims=True),
                  cmean_ref[...], preferred_element_type=jnp.float32)
    inv = lax.rsqrt(var + EPS)

    y = centered * inv * gamma_ref[...] + beta_ref[...]
    out_ref[...] = jnp.maximum(y, 0.0)


def _band_weights(w_oihw, W):
    """Fold kw taps + W-direction zero padding of a 'same' conv into
    (KH, W*Cin, W*Cout) band slabs, so the kernel only needs row (kh) shifts."""
    Cout, Cin, KH, KW = w_oihw.shape
    w_hwio = jnp.transpose(w_oihw, (2, 3, 1, 0)).astype(jnp.float32)  # (KH,KW,Cin,Cout)
    wi = jnp.arange(W)[:, None]
    wo = jnp.arange(W)[None, :]
    kw = wi - wo + KW // 2                                     # (W, W)
    valid = (kw >= 0) & (kw < KW)
    taps = w_hwio[:, jnp.clip(kw, 0, KW - 1)]                  # (KH, W, W, Cin, Cout)
    taps = taps * valid[None, :, :, None, None].astype(jnp.float32)
    # (KH, wi, ci, wo, co) -> (KH, W*Cin, W*Cout)
    return jnp.transpose(taps, (0, 1, 3, 2, 4)).reshape(KH, W * Cin, W * Cout)


def conv_block1_forward(x_nchw, w_oihw, bias, gamma, beta):
    """PyTorch-facing API: x (N, Cin, H, W) f32 -> (N, Cout, H, W) f32."""
    N, Cin, H, W = x_nchw.shape
    Cout, _, KH, KW = w_oihw.shape

    # Layout plumbing: one transpose in, one transpose out.  No jnp.pad — the
    # spatial zero padding is handled by the band weights (W) and in-kernel
    # row masks (H).
    x2d = jnp.transpose(x_nchw, (0, 2, 3, 1)).reshape(N * H, W * Cin)
    x2d = x2d.astype(jnp.float32)

    w_band = _band_weights(w_oihw, W)                           # (KH, W*Cin, W*Cout)
    bias_t = jnp.tile(bias.astype(jnp.float32), W)[None, :]     # (1, W*Cout)
    gamma_t = jnp.tile(gamma.astype(jnp.float32), W)[None, :]
    beta_t = jnp.tile(beta.astype(jnp.float32), W)[None, :]

    # Per-channel (stride-Cout) sum-and-broadcast matrix, prescaled by 1/(N*H*W).
    lane = jnp.arange(W * Cout)
    cmean = (lane[:, None] % Cout == lane[None, :] % Cout).astype(jnp.float32)
    cmean = cmean / float(N * H * W)

    kernel = functools.partial(_conv_bn_relu_kernel, H=H)
    out2d = pl.pallas_call(
        kernel,
        out_shape=jax.ShapeDtypeStruct((N * H, W * Cout), jnp.float32),
        in_specs=[pl.BlockSpec(memory_space=pltpu.MemorySpace.VMEM)] * 6,
        out_specs=pl.BlockSpec(memory_space=pltpu.MemorySpace.VMEM),
    )(x2d, w_band, bias_t, gamma_t, beta_t, cmean)

    return jnp.transpose(out2d.reshape(N, H, W, Cout), (0, 3, 1, 2))


def reference_forward(x, w, b, gamma, beta):
    """Pure-JAX reference mirroring PyTorch training-mode conv_block1."""
    y = lax.conv_general_dilated(
        x, w, window_strides=(1, 1), padding=[(1, 1), (1, 1)],
        dimension_numbers=("NCHW", "OIHW", "NCHW"),
    ) + b.reshape(1, -1, 1, 1)
    mean = jnp.mean(y, axis=(0, 2, 3), keepdims=True)
    var = jnp.mean((y - mean) ** 2, axis=(0, 2, 3), keepdims=True)
    yn = (y - mean) / jnp.sqrt(var + EPS)
    yn = yn * gamma.reshape(1, -1, 1, 1) + beta.reshape(1, -1, 1, 1)
    return jnp.maximum(yn, 0.0)


if __name__ == "__main__":
    N, Cin, Cout, H, W, K = 2, 4, 8, 16, 16, 3

    key = jax.random.PRNGKey(0)
    kx, kw, kb = jax.random.split(key, 3)

    x = jax.random.normal(kx, (N, Cin, H, W), dtype=jnp.float32)

    # Deterministic synthetic parameters (shapes from nn.Conv2d / nn.BatchNorm2d).
    fan_in = Cin * K * K
    bound = 1.0 / (fan_in ** 0.5)
    w_conv = jax.random.uniform(kw, (Cout, Cin, K, K), jnp.float32, -bound, bound)
    b_conv = jax.random.uniform(kb, (Cout,), jnp.float32, -bound, bound)
    gamma = jnp.ones((Cout,), jnp.float32)   # BatchNorm2d default init
    beta = jnp.zeros((Cout,), jnp.float32)

    fwd = jax.jit(conv_block1_forward)
    out = jax.block_until_ready(fwd(x, w_conv, b_conv, gamma, beta))

    ref = jax.block_until_ready(reference_forward(x, w_conv, b_conv, gamma, beta))
    assert out.shape == (N, Cout, H, W)
    assert jnp.max(jnp.abs(out - ref)) < 1e-4, "mismatch vs reference"

    print("KERNEL_OK")
</pallas_src>

<mosaic_0001>
module attributes {stable_mosaic.version = 11 : i64} {
  func.func @_conv_bn_relu_kernel(%arg0: memref<32x64xf32, #tpu.memory_space<vmem>>, %arg1: memref<3x64x128xf32, #tpu.memory_space<vmem>>, %arg2: memref<1x128xf32, #tpu.memory_space<vmem>>, %arg3: memref<1x128xf32, #tpu.memory_space<vmem>>, %arg4: memref<1x128xf32, #tpu.memory_space<vmem>>, %arg5: memref<128x128xf32, #tpu.memory_space<vmem>>, %arg6: memref<32x128xf32, #tpu.memory_space<vmem>>) attributes {dimension_semantics = [], scalar_prefetch = 0 : i64, scratch_operands = 0 : i64, tpu.core_type = #tpu.core_type<tc>} {
    %c0 = arith.constant 0 : index
    %c0_0 = arith.constant 0 : index
    %0 = vector.load %arg0[%c0, %c0_0] : memref<32x64xf32, #tpu.memory_space<vmem>>, vector<32x64xf32>
    %1 = tpu.iota {dimensions = array<i32: 0>} : vector<32x1xi32>
    %c16_i32 = arith.constant 16 : i32
    %c0_i32 = arith.constant 0 : i32
    %2 = arith.cmpi eq, %c16_i32, %c0_i32 : i32
    %c1_i32 = arith.constant 1 : i32
    %3 = arith.select %2, %c1_i32, %c16_i32 : i32
    %4 = vector.broadcast %3 : i32 to vector<32x1xi32>
    %5 = arith.remsi %1, %4 : vector<32x1xi32>
    %c0_i32_1 = arith.constant 0 : i32
    %6 = vector.broadcast %c0_i32_1 : i32 to vector<32x1xi32>
    %7 = arith.cmpi ne, %5, %6 : vector<32x1xi32>
    %c0_i32_2 = arith.constant 0 : i32
    %8 = vector.broadcast %c0_i32_2 : i32 to vector<32x1xi32>
    %9 = arith.cmpi slt, %5, %8 : vector<32x1xi32>
    %c0_i32_3 = arith.constant 0 : i32
    %10 = arith.cmpi slt, %3, %c0_i32_3 : i32
    %11 = vector.broadcast %10 : i1 to vector<32x1xi1>
    %12 = vector.broadcast %11 : vector<32x1xi1> to vector<32x1xi1>
    %13 = arith.xori %9, %12 : vector<32x1xi1>
    %14 = arith.andi %13, %7 : vector<32x1xi1>
    %15 = vector.broadcast %3 : i32 to vector<32x1xi32>
    %16 = arith.addi %5, %15 : vector<32x1xi32>
    %17 = arith.select %14, %16, %5 : vector<32x1xi1>, vector<32x1xi32>
    %cst = arith.constant 0.000000e+00 : f32
    %18 = vector.broadcast %cst : f32 to vector<32x128xf32>
    %c1_i32_4 = arith.constant 1 : i32
    %19 = tpu.dynamic_rotate %0 by %c1_i32_4 dim 0 : vector<32x64xf32>, i32 -> vector<32x64xf32>
    %c1_i32_5 = arith.constant 1 : i32
    %20 = vector.broadcast %c1_i32_5 : i32 to vector<32x1xi32>
    %21 = arith.cmpi sge, %17, %20 : vector<32x1xi32>
    %cst_6 = arith.constant 0.000000e+00 : f32
    %22 = vector.shape_cast %21 : vector<32x1xi1> to vector<32x1xi1>
    %23 = vector.broadcast %22 : vector<32x1xi1> to vector<32x64xi1>
    %24 = vector.broadcast %cst_6 : f32 to vector<32x64xf32>
    %25 = arith.select %23, %19, %24 : vector<32x64xi1>, vector<32x64xf32>
    %c0_7 = arith.constant 0 : index
    %c0_8 = arith.constant 0 : index
    %c0_9 = arith.constant 0 : index
    %26 = vector.load %arg1[%c0_7, %c0_8, %c0_9] : memref<3x64x128xf32, #tpu.memory_space<vmem>>, vector<1x64x128xf32>
    %27 = vector.shape_cast %26 : vector<1x64x128xf32> to vector<64x128xf32>
    %cst_10 = arith.constant dense<0.000000e+00> : vector<32x128xf32>
    %28 = tpu.matmul %25, %27, %cst_10 {dimension_numbers = #tpu.dot_dimension_numbers<[1], [0], [0], [1], [0, 0, 1, 1], [], []>} : vector<32x64xf32>, vector<64x128xf32>, vector<32x128xf32> -> vector<32x128xf32>
    %29 = arith.addf %18, %28 : vector<32x128xf32>
    %c1 = arith.constant 1 : index
    %c0_11 = arith.constant 0 : index
    %c0_12 = arith.constant 0 : index
    %30 = vector.load %arg1[%c1, %c0_11, %c0_12] : memref<3x64x128xf32, #tpu.memory_space<vmem>>, vector<1x64x128xf32>
    %31 = vector.shape_cast %30 : vector<1x64x128xf32> to vector<64x128xf32>
    %cst_13 = arith.constant dense<0.000000e+00> : vector<32x128xf32>
    %32 = tpu.matmul %0, %31, %cst_13 {dimension_numbers = #tpu.dot_dimension_numbers<[1], [0], [0], [1], [0, 0, 1, 1], [], []>} : vector<32x64xf32>, vector<64x128xf32>, vector<32x128xf32> -> vector<32x128xf32>
    %33 = arith.addf %29, %32 : vector<32x128xf32>
    %c31_i32 = arith.constant 31 : i32
    %34 = tpu.dynamic_rotate %0 by %c31_i32 dim 0 : vector<32x64xf32>, i32 -> vector<32x64xf32>
    %c15_i32 = arith.constant 15 : i32
    %35 = vector.broadcast %c15_i32 : i32 to vector<32x1xi32>
    %36 = arith.cmpi slt, %17, %35 : vector<32x1xi32>
    %cst_14 = arith.constant 0.000000e+00 : f32
    %37 = vector.shape_cast %36 : vector<32x1xi1> to vector<32x1xi1>
    %38 = vector.broadcast %37 : vector<32x1xi1> to vector<32x64xi1>
    %39 = vector.broadcast %cst_14 : f32 to vector<32x64xf32>
    %40 = arith.select %38, %34, %39 : vector<32x64xi1>, vector<32x64xf32>
    %c2 = arith.constant 2 : index
    %c0_15 = arith.constant 0 : index
    %c0_16 = arith.constant 0 : index
    %41 = vector.load %arg1[%c2, %c0_15, %c0_16] : memref<3x64x128xf32, #tpu.memory_space<vmem>>, vector<1x64x128xf32>
    %42 = vector.shape_cast %41 : vector<1x64x128xf32> to vector<64x128xf32>
    %cst_17 = arith.constant dense<0.000000e+00> : vector<32x128xf32>
    %43 = tpu.matmul %40, %42, %cst_17 {dimension_numbers = #tpu.dot_dimension_numbers<[1], [0], [0], [1], [0, 0, 1, 1], [], []>} : vector<32x64xf32>, vector<64x128xf32>, vector<32x128xf32> -> vector<32x128xf32>
    %44 = arith.addf %33, %43 : vector<32x128xf32>
    %c0_18 = arith.constant 0 : index
    %c0_19 = arith.constant 0 : index
    %45 = vector.load %arg2[%c0_18, %c0_19] : memref<1x128xf32, #tpu.memory_space<vmem>>, vector<1x128xf32>
    %46 = vector.broadcast %45 : vector<1x128xf32> to vector<32x128xf32>
    %47 = arith.addf %44, %46 : vector<32x128xf32>
    %cst_20 = arith.constant dense<0.000000e+00> : vector<128xf32>
    %48 = vector.multi_reduction <add>, %47, %cst_20 [0] : vector<32x128xf32> to vector<128xf32>
    %49 = vector.shape_cast %48 : vector<128xf32> to vector<1x128xf32>
    %c0_21 = arith.constant 0 : index
    %c0_22 = arith.constant 0 : index
    %50 = vector.load %arg5[%c0_21, %c0_22] : memref<128x128xf32, #tpu.memory_space<vmem>>, vector<128x128xf32>
    %cst_23 = arith.constant dense<0.000000e+00> : vector<1x128xf32>
    %51 = tpu.matmul %49, %50, %cst_23 {dimension_numbers = #tpu.dot_dimension_numbers<[1], [0], [0], [1], [0, 0, 1, 1], [], []>} : vector<1x128xf32>, vector<128x128xf32>, vector<1x128xf32> -> vector<1x128xf32>
    %52 = vector.broadcast %51 : vector<1x128xf32> to vector<32x128xf32>
    %53 = arith.subf %47, %52 : vector<32x128xf32>
    %54 = arith.mulf %53, %53 : vector<32x128xf32>
    %cst_24 = arith.constant dense<0.000000e+00> : vector<128xf32>
    %55 = vector.multi_reduction <add>, %54, %cst_24 [0] : vector<32x128xf32> to vector<128xf32>
    %56 = vector.shape_cast %55 : vector<128xf32> to vector<1x128xf32>
    %c0_25 = arith.constant 0 : index
    %c0_26 = arith.constant 0 : index
    %57 = vector.load %arg5[%c0_25, %c0_26] : memref<128x128xf32, #tpu.memory_space<vmem>>, vector<128x128xf32>
    %cst_27 = arith.constant dense<0.000000e+00> : vector<1x128xf32>
    %58 = tpu.matmul %56, %57, %cst_27 {dimension_numbers = #tpu.dot_dimension_numbers<[1], [0], [0], [1], [0, 0, 1, 1], [], []>} : vector<1x128xf32>, vector<128x128xf32>, vector<1x128xf32> -> vector<1x128xf32>
    %cst_28 = arith.constant 9.99999974E-6 : f32
    %59 = vector.broadcast %cst_28 : f32 to vector<1x128xf32>
    %60 = arith.addf %58, %59 : vector<1x128xf32>
    %61 = math.rsqrt %60 : vector<1x128xf32>
    %62 = vector.broadcast %61 : vector<1x128xf32> to vector<32x128xf32>
    %63 = arith.mulf %53, %62 : vector<32x128xf32>
    %c0_29 = arith.constant 0 : index
    %c0_30 = arith.constant 0 : index
    %64 = vector.load %arg3[%c0_29, %c0_30] : memref<1x128xf32, #tpu.memory_space<vmem>>, vector<1x128xf32>
    %65 = vector.broadcast %64 : vector<1x128xf32> to vector<32x128xf32>
    %66 = arith.mulf %63, %65 : vector<32x128xf32>
    %c0_31 = arith.constant 0 : index
    %c0_32 = arith.constant 0 : index
    %67 = vector.load %arg4[%c0_31, %c0_32] : memref<1x128xf32, #tpu.memory_space<vmem>>, vector<1x128xf32>
    %68 = vector.broadcast %67 : vector<1x128xf32> to vector<32x128xf32>
    %69 = arith.addf %66, %68 : vector<32x128xf32>
    %cst_33 = arith.constant 0.000000e+00 : f32
    %70 = vector.broadcast %cst_33 : f32 to vector<32x128xf32>
    %71 = arith.maximumf %69, %70 : vector<32x128xf32>
    %c0_34 = arith.constant 0 : index
    %c0_35 = arith.constant 0 : index
    %72 = vector.load %arg6[%c0_34, %c0_35] : memref<32x128xf32, #tpu.memory_space<vmem>>, vector<32x128xf32>
    tpu.vector_store %arg6[%c0_34, %c0_35], %71 {strides = array<i32>} : memref<32x128xf32, #tpu.memory_space<vmem>>, vector<32x128xf32>,
    return
  }
}

</mosaic_0001>

<bundles_post_ra>
// kernel: tile.18
= control target key start
LH: loop header
LB: loop body
LE: loop exit
PB: predicated region body
PF: predicated region fallthrough
CT: control target
= control target key end

     0   :  { %s28_s0 = inlined_call_operand.vmem [shape: f32[8], index: 0, kind: input, shape index: {}]   ;;  %s29_s1 = inlined_call_operand.vmem [shape: f32[16,8], index: 1, kind: output, shape index: {}]  }
   0x1   :  { %v4_v0 = vld [vmem:[%s28_s0] ss:$0 sm:$0xff] }
   0x2   :  { %5 = vst [vmem:[%s29_s1] sm:$0xff] %v4_v0  ;;  %8 = vst [vmem:[%s29_s1 + $0x8] sm:$0xff] %v4_v0 }

// kernel: tile.19
= control target key start
LH: loop header
LB: loop body
LE: loop exit
PB: predicated region body
PF: predicated region fallthrough
CT: control target
= control target key end

     0   :  { %s133_s10 = smov 120   ;;  %s134_s11 = smov 104   ;;  %vm3_vm0 = vcmask 64512   ;;  %vm9_vm1 = vcmask 1048512   ;;  %vm15_vm2 = vcmask 982912   ;;  %vm21_vm3 = vcmask 917312   ;;  %s209_s0 = inlined_call_operand.vmem [shape: f32[16,8], index: 0, kind: input, shape index: {}]   ;;  %s210_s1 = inlined_call_operand.vmem [shape: f32[1,128], index: 1, kind: output, shape index: {}]  }
   0x1   :  { %v103_v0 = vld [vmem:[%s209_s0 + $0xf] sm:$0x1]   ;;  %v105_v1 = vld [vmem:[%s209_s0 + $0xd] sm:$0x1]   ;;  %v104_v2 = vld [vmem:[%s209_s0 + $0xe] sm:$0x1]  }
   0x2   :  { %7 = vrot.lane.b32.xlu0 %v103_v0, %s133_s10  ;;  %19 = vrot.lane.b32.xlu1 %v105_v1, %s134_s11  ;;  %v106_v3 = vld [vmem:[%s209_s0 + $0xc] sm:$0x1]   ;;  %s135_s16 = smov 112   ;;  %s136_s17 = smov 96   ;;  %v107_v4 = vld [vmem:[%s209_s0 + $0xb] sm:$0x1]  }
   0x3   :  { %v108_v5 = vld [vmem:[%s209_s0 + $0xa] sm:$0x1]   ;;  %v2_v6 = vld [vmem:[%s209_s0] sm:$0x1]   ;;  %s137_s24 = smov 88   ;;  %s138_s25 = smov 80  }
   0x4   :  { %4 = vst.msk [vmem:[#allocation0] sm:$0x1] %vm3_vm0, %v2_v6   ;;  %v109_v7 = vld [vmem:[%s209_s0 + $0x9] sm:$0x1]   ;;  %v110_v8 = vld [vmem:[%s209_s0 + $0x8] sm:$0x1]  }
   0x5   :  { %s139_s30 = smov 72   ;;  %s140_s2 = smov 64   ;;  %v111_v9 = vld [vmem:[%s209_s0 + $0x7] sm:$0x1]   ;;  %v112_v10 = vld [vmem:[%s209_s0 + $0x6] sm:$0x1]  }
   0x6   :  { %13 = vrot.lane.b32.xlu0 %v104_v2, %s135_s16  ;;  %25 = vrot.lane.b32.xlu1 %v106_v3, %s136_s17  ;;  %s141_s7 = smov 56   ;;  %s142_s8 = smov 48   ;;  %v113_v11 = vld [vmem:[%s209_s0 + $0x5] sm:$0x1]   ;;  %v114_v12 = vld [vmem:[%s209_s0 + $0x4] sm:$0x1]  }
   0x7   :  { %s143_s13 = smov 40   ;;  %s144_s14 = smov 32   ;;  %v115_v13 = vld [vmem:[%s209_s0 + $0x3] sm:$0x1]   ;;  %v116_v14 = vld [vmem:[%s209_s0 + $0x2] sm:$0x1]  }
   0x8   :  { %s145_s19 = smov 24   ;;  %s146_s20 = smov 16   ;;  %v117_v15 = vld [vmem:[%s209_s0 + $0x1] sm:$0x1]   ;;  %vm27_vm4 = vcmask 851712   ;;  %vm33_vm5 = vcmask 786112  }
   0x9   :  { %s147_s0 = smov 8   ;;  %vm39_vm6 = vcmask 720512   ;;  %vm45_vm7 = vcmask 654912   ;;  %vm51_vm8 = vcmask 589312   ;;  %vm57_vm9 = vcmask 523712  }
   0xa   :  { %31 = vrot.lane.b32.xlu0 %v107_v4, %s137_s24  ;;  %37 = vrot.lane.b32.xlu1 %v108_v5, %s138_s25  ;;  %vm63_vm10 = vcmask 458112   ;;  %vm69_vm11 = vcmask 392512   ;;  %vm75_vm12 = vcmask 326912   ;;  %vm81_vm13 = vcmask 261312  }
   0xb   :  { %vm87_vm14 = vcmask 195712   ;;  %vm93_vm15 = vcmask 130112  }
   0xe   :  { %43 = vrot.lane.b32.xlu0 %v109_v7, %s139_s30  ;;  %49 = vrot.lane.b32.xlu1 %v110_v8, %s140_s2 }
  0x12   :  { %55 = vrot.lane.b32.xlu0 %v111_v9, %s141_s7  ;;  %61 = vrot.lane.b32.xlu1 %v112_v10, %s142_s8 }
  0x16   :  { %67 = vrot.lane.b32.xlu0 %v113_v11, %s143_s13  ;;  %73 = vrot.lane.b32.xlu1 %v114_v12, %s144_s14 }
  0x1a   :  { %79 = vrot.lane.b32.xlu0 %v115_v13, %s145_s19  ;;  %85 = vrot.lane.b32.xlu1 %v116_v14, %s146_s20 }
  0x1e   :  { %91 = vrot.lane.b32.xlu0 %v117_v15, %s147_s0 }
  0x74   :  { %v8_v16 = vpop.permute.xlu0 %7   ;;  %v20_v17 = vpop.permute.xlu1 %19  }
  0x75   :  { %10 = vst.msk [vmem:[#allocation0] sm:$0x1] %vm9_vm1, %v8_v16  }
  0x78   :  { %v14_v18 = vpop.permute.xlu0 %13   ;;  %v26_v19 = vpop.permute.xlu1 %25  }
  0x79   :  { %16 = vst.msk [vmem:[#allocation0] sm:$0x1] %vm15_vm2, %v14_v18  }
  0x7a   :  { %22 = vst.msk [vmem:[#allocation0] sm:$0x1] %vm21_vm3, %v20_v17  }
  0x7b   :  { %28 = vst.msk [vmem:[#allocation0] sm:$0x1] %vm27_vm4, %v26_v19  }
  0x7c   :  { %v32_v20 = vpop.permute.xlu0 %31   ;;  %v38_v21 = vpop.permute.xlu1 %37  }
  0x7d   :  { %34 = vst.msk [vmem:[#allocation0] sm:$0x1] %vm33_vm5, %v32_v20  }
  0x7e   :  { %40 = vst.msk [vmem:[#allocation0] sm:$0x1] %vm39_vm6, %v38_v21  }
  0x80   :  { %v44_v22 = vpop.permute.xlu0 %43   ;;  %v50_v23 = vpop.permute.xlu1 %49  }
  0x81   :  { %46 = vst.msk [vmem:[#allocation0] sm:$0x1] %vm45_vm7, %v44_v22  }
  0x82   :  { %52 = vst.msk [vmem:[#allocation0] sm:$0x1] %vm51_vm8, %v50_v23  }
  0x84   :  { %v56_v24 = vpop.permute.xlu0 %55   ;;  %v62_v25 = vpop.permute.xlu1 %61  }
  0x85   :  { %58 = vst.msk [vmem:[#allocation0] sm:$0x1] %vm57_vm9, %v56_v24  }
  0x86   :  { %64 = vst.msk [vmem:[#allocation0] sm:$0x1] %vm63_vm10, %v62_v25  }
  0x88   :  { %v68_v26 = vpop.permute.xlu0 %67   ;;  %v74_v27 = vpop.permute.xlu1 %73  }
  0x89   :  { %70 = vst.msk [vmem:[#allocation0] sm:$0x1] %vm69_vm11, %v68_v26  }
  0x8a   :  { %76 = vst.msk [vmem:[#allocation0] sm:$0x1] %vm75_vm12, %v74_v27  }
  0x8c   :  { %v80_v28 = vpop.permute.xlu0 %79   ;;  %v86_v29 = vpop.permute.xlu1 %85  }
  0x8d   :  { %82 = vst.msk [vmem:[#allocation0] sm:$0x1] %vm81_vm13, %v80_v28  }
  0x8e   :  { %88 = vst.msk [vmem:[#allocation0] sm:$0x1] %vm87_vm14, %v86_v29  }
  0x90   :  { %v92_v30 = vpop.permute.xlu0 %91  }
  0x91   :  { %94 = vst.msk [vmem:[#allocation0] sm:$0x1] %vm93_vm15, %v92_v30  }
  0x98   :  { %v99_v31 = vld [vmem:[#allocation0] sm:$0x1] }
  0x99   :  { %102 = vst [vmem:[%s210_s1] sm:$0x1] %v99_v31 }

// kernel: conv_block1_forward.1
= control target key start
LH: loop header
LB: loop body
LE: loop exit
PB: predicated region body
PF: predicated region fallthrough
CT: control target
= control target key end

     0   :  { %v27_v0 = vlaneseq  ;;  %vm122_vm2 = vcmask 523264   ;;  %v933_v59 = vmov 0.0   ;;  %vm934_vm7 = vmmov 0   ;;  %s1226_s1 = inlined_call_operand.vmem [shape: f32[3,64,128], index: 1, kind: input, shape index: {}]   ;;  %s1227_s0 = inlined_call_operand.vmem [shape: f32[32,64], index: 0, kind: input, shape index: {}]   ;;  %s1228_s5 = inlined_call_operand.vmem [shape: f32[128,128], index: 5, kind: input, shape index: {}]   ;;  %s1229_s2 = inlined_call_operand.vmem [shape: f32[1,128], index: 2, kind: input, shape index: {}]   ;;  %s1230_s3 = inlined_call_operand.vmem [shape: f32[1,128], index: 3, kind: input, shape index: {}]   ;;  %s1231_s4 = inlined_call_operand.vmem [shape: f32[1,128], index: 4, kind: input, shape index: {}]   ;;  %s1232_s6 = inlined_call_operand.vmem [shape: f32[32,128], index: 6, kind: output, shape index: {}]  }
   0x1   :  { %v699_v1 = vld [vmem:[%s1226_s1 + $0x78] sm:$0xff]  ;;  %v698_v3 = vld [vmem:[%s1226_s1 + $0x70] sm:$0xff]  ;;  %v697_v5 = vld [vmem:[%s1226_s1 + $0x68] sm:$0xff] }
   0x2   :  { %v112_v2 = vld [vmem:[%s1226_s1 + $0x38] sm:$0xff]  ;;  %793 = vmatprep.subr.mxu0 %v699_v1  ;;  %v111_v4 = vld [vmem:[%s1226_s1 + $0x30] sm:$0xff]  ;;  %v110_v6 = vld [vmem:[%s1226_s1 + $0x28] sm:$0xff]  ;;  %v988_v7 = vshrl.u32 %v27_v0, 7 }
   0x3   :  { %815 = vmatprep.subr.mxu1 %v112_v2  ;;  %794 = vmatpush3.msra.mxu0 %v699_v1  ;;  %v696_v8 = vld [vmem:[%s1226_s1 + $0x60] sm:$0xff]  ;;  %v1004_v11 = vld [vmem:[%s1227_s0 + $0x18] sm:$0xff]  ;;  %v694_v15 = vld [vmem:[%s1226_s1 + $0x50] sm:$0xff] }
   0x4   :  { %816 = vmatpush3.msra.mxu1 %v112_v2  ;;  %795 = vmatprep.subr.mxu0 %v698_v3  ;;  %v109_v9 = vld [vmem:[%s1226_s1 + $0x20] sm:$0xff]  ;;  %v695_v12 = vld [vmem:[%s1226_s1 + $0x58] sm:$0xff]  ;;  %v30_v14 = vadd.s32 16, %v988_v7  ;;  %v36_v17 = vand.u32 15, %v988_v7  ;;  %v83_v18 = vrot.slane %v1004_v11, 7  ;;  %v107_v19 = vld [vmem:[%s1226_s1 + $0x10] sm:$0xff] }
   0x5   :  { %817 = vmatprep.subr.mxu1 %v111_v4  ;;  %796 = vmatpush3.msra.mxu0 %v698_v3  ;;  %v999_v10 = vld [vmem:[%s1227_s0] sm:$0xff]  ;;  %v108_v13 = vld [vmem:[%s1226_s1 + $0x18] sm:$0xff]  ;;  %vm84_vm0 = vcmp.lt.s32.totalorder %v988_v7, 1  ;;  %v1026_v20 = vld [vmem:[%s1227_s0 + $0x8] sm:$0xff]  ;;  %vm321_vm4 = vcmp.lt.s32.totalorder %v988_v7, 7  ;;  %v29_v43 = vadd.s32 8, %v988_v7 }
   0x6   :  { %818 = vmatpush3.msra.mxu1 %v111_v4  ;;  %797 = vmatprep.subr.mxu0 %v697_v5  ;;  %v80_v16 = vrot.slane %v999_v10, 7  ;;  %v1031_v21 = vld [vmem:[%s1227_s0 + $0x10] sm:$0xff]  ;;  %v693_v22 = vld [vmem:[%s1226_s1 + $0x48] sm:$0xff]  ;;  %v50_v25 = vand.u32 15, %v30_v14  ;;  %vm1042_vm1 = vcmp.ge.s32.totalorder %v36_v17, 1  ;;  %v81_v28 = vrot.slane %v1026_v20, 7 }
   0x7   :  { %819 = vmatprep.subr.mxu1 %v110_v6  ;;  %798 = vmatpush3.msra.mxu0 %v697_v5  ;;  %v106_v23 = vld [vmem:[%s1226_s1 + $0x8] sm:$0xff]  ;;  %v82_v24 = vrot.slane %v1031_v21, 7  ;;  %v692_v29 = vld [vmem:[%s1226_s1 + $0x40] sm:$0xff]  ;;  %v715_v35 = vld [vmem:[%s1226_s1 + $0xb8] sm:$0xff]  ;;  %v317_v36 = vrot.slane %v999_v10, 1  ;;  %v318_v37 = vrot.slane %v1026_v20, 1 }
   0x8   :  { %820 = vmatpush3.msra.mxu1 %v110_v6  ;;  %799 = vmatprep.subr.mxu0 %v696_v8  ;;  %v88_v26 = vsel %vm84_vm0, %v83_v18, %v80_v16  ;;  %v105_v30 = vld [vmem:[%s1226_s1] sm:$0xff]  ;;  %vm1057_vm3 = vcmp.ge.s32.totalorder %v50_v25, 1  ;;  %v87_v34 = vsel %vm84_vm0, %v80_v16, %v81_v28  ;;  %v714_v39 = vld [vmem:[%s1226_s1 + $0xb0] sm:$0xff]  ;;  %v713_v41 = vld [vmem:[%s1226_s1 + $0xa8] sm:$0xff]  ;;  %v319_v46 = vrot.slane %v1031_v21, 1 }
   0x9   :  { %821 = vmatprep.subr.mxu1 %v109_v9  ;;  %800 = vmatpush3.msra.mxu0 %v696_v8  ;;  %v101_v31 = vsel %vm1042_vm1, %v88_v26, 0.0  ;;  %v86_v32 = vsel %vm84_vm0, %v81_v28, %v82_v24  ;;  %v85_v40 = vsel %vm84_vm0, %v82_v24, %v83_v18  ;;  %v324_v42 = vsel %vm321_vm4, %v317_v36, %v318_v37  ;;  %v712_v44 = vld [vmem:[%s1226_s1 + $0xa0] sm:$0xff]  ;;  %v711_v45 = vld [vmem:[%s1226_s1 + $0x98] sm:$0xff]  ;;  %v710_v49 = vld [vmem:[%s1226_s1 + $0x90] sm:$0xff] }
   0xa   :  { %822 = vmatpush3.msra.mxu1 %v109_v9  ;;  %801 = vmatprep.subr.mxu0 %v695_v12  ;;  %v103_v38 = vsel %vm1057_vm3, %v86_v32, 0.0  ;;  %v43_v47 = vand.u32 15, %v29_v43  ;;  %v31_v48 = vadd.s32 24, %v988_v7  ;;  %v709_v50 = vld [vmem:[%s1226_s1 + $0x88] sm:$0xff]  ;;  %v323_v51 = vsel %vm321_vm4, %v318_v37, %v319_v46  ;;  %v708_v54 = vld [vmem:[%s1226_s1 + $0x80] sm:$0xff]  ;;  %v487_v60 = vld [vmem:[%s1228_s5 + $0x78] sm:$0xff] }
   0xb   :  { %823 = vmatprep.subr.mxu1 %v108_v13  ;;  %802 = vmatpush3.msra.mxu0 %v695_v12  ;;  %v320_v52 = vrot.slane %v1004_v11, 1  ;;  %v486_v61 = vld [vmem:[%s1228_s5 + $0x70] sm:$0xff]  ;;  %v485_v62 = vld [vmem:[%s1228_s5 + $0x68] sm:$0xff]  ;;  %v484_v63 = vld [vmem:[%s1228_s5 + $0x60] sm:$0xff] }
   0xc   :  { %824 = vmatpush3.msra.mxu1 %v108_v13  ;;  %803 = vmatprep.subr.mxu0 %v694_v15  ;;  %vm327_vm5 = vcmp.lt.s32.totalorder %v43_v47, 15  ;;  %v57_v53 = vand.u32 15, %v31_v48  ;;  %v483_v0 = vld [vmem:[%s1228_s5 + $0x58] sm:$0xff]  ;;  %v482_v1 = vld [vmem:[%s1228_s5 + $0x50] sm:$0xff]  ;;  %v481_v2 = vld [vmem:[%s1228_s5 + $0x48] sm:$0xff]  ;;  %v560_v47 = vsub.s32 0, %v988_v7 }
   0xd   :  { %825 = vmatprep.subr.mxu1 %v107_v19  ;;  %804 = vmatpush3.msra.mxu0 %v694_v15  ;;  %v339_v55 = vsel %vm327_vm5, %v323_v51, 0.0  ;;  %v322_v56 = vsel %vm321_vm4, %v319_v46, %v320_v52  ;;  %v325_v57 = vsel %vm321_vm4, %v320_v52, %v317_v36  ;;  %v480_v3 = vld [vmem:[%s1228_s5 + $0x40] sm:$0xff]  ;;  %v479_v4 = vld [vmem:[%s1228_s5 + $0x38] sm:$0xff]  ;;  %v478_v5 = vld [vmem:[%s1228_s5 + $0x30] sm:$0xff] }
   0xe   :  { %826 = vmatpush3.msra.mxu1 %v107_v19  ;;  %805 = vmatprep.subr.mxu0 %v693_v22  ;;  %vm329_vm6 = vcmp.lt.s32.totalorder %v57_v53, 15  ;;  %v477_v6 = vld [vmem:[%s1228_s5 + $0x28] sm:$0xff]  ;;  %v476_v8 = vld [vmem:[%s1228_s5 + $0x20] sm:$0xff]  ;;  %v475_v9 = vld [vmem:[%s1228_s5 + $0x18] sm:$0xff] }
   0xf   :  { %827 = vmatprep.subr.mxu1 %v106_v23  ;;  %806 = vmatpush3.msra.mxu0 %v693_v22  ;;  %v341_v58 = vsel %vm329_vm6, %v325_v57, 0.0  ;;  %v472_v12 = vld [vmem:[%s1228_s5] sm:$0xff] }
  0x10   :  { %828 = vmatpush3.msra.mxu1 %v106_v23  ;;  %807 = vmatprep.subr.mxu0 %v692_v29  ;;  %v720_v27 = vld [vmem:[%s1229_s2] ss:$0 sm:$0xff] }
  0x11   :  { %829 = vmatprep.subr.mxu1 %v105_v30  ;;  %808 = vmatpush3.msra.mxu0 %v692_v29 }
  0x12   :  { %809 = vmatprep.mubr.msk.f32.mxu0 %vm122_vm2, %v999_v10  ;;  %830 = vmatpush3.msra.mxu1 %v105_v30  ;;  %v474_v10 = vld [vmem:[%s1228_s5 + $0x10] sm:$0xff] }
  0x13   :  { %831 = vmatprep.mubr.msk.f32.mxu1 %vm122_vm2, %v101_v31  ;;  %810 = vmatmul.mubr.msk.f32.vlgmr.msra.gmra.mxu0 %vm122_vm2, %v1026_v20 }
  0x14   :  { %832 = vmatmul.mubr.msk.f32.vlgmr.msra.gmra.mxu1 %vm122_vm2, %v87_v34  ;;  %837 = vmatprep.subr.mxu0 %v715_v35 }
  0x15   :  { %812 = vmatprep.mubr.msk.f32.mxu0 %vm122_vm2, %v1031_v21  ;;  %838 = vmatpush3.msra.mxu0 %v715_v35 }
  0x16   :  { %834 = vmatprep.mubr.msk.f32.mxu1 %vm122_vm2, %v103_v38  ;;  %839 = vmatprep.subr.mxu0 %v714_v39 }
  0x17   :  { %840 = vmatpush3.msra.mxu0 %v714_v39  ;;  %859 = vmatprep.subr.mxu1 %v933_v59 }
  0x18   :  { %835 = vmatmul.mubr.msk.f32.gmra.mxu1 %vm122_vm2, %v85_v40  ;;  %841 = vmatprep.subr.mxu0 %v713_v41 }
  0x19   :  { %813 = vmatmul.mubr.msk.f32.gmra.mxu0 %vm122_vm2, %v1004_v11  ;;  %860 = vmatpush3.msra.mxu1 %v487_v60  ;;  %v473_v11 = vld [vmem:[%s1228_s5 + $0x8] sm:$0xff] }
  0x1a   :  { %842 = vmatpush3.msra.mxu0 %v713_v41  ;;  %853 = vmatprep.mubr.msk.f32.mxu0 %vm122_vm2, %v324_v42 }
  0x1b   :  { %843 = vmatprep.subr.mxu0 %v712_v44  ;;  %861 = vmatprep.subr.mxu1 %v933_v59 }
  0x1c   :  { %844 = vmatpush3.msra.mxu0 %v712_v44  ;;  %862 = vmatpush3.msra.mxu1 %v486_v61 }
  0x1d   :  { %845 = vmatprep.subr.mxu0 %v711_v45  ;;  %863 = vmatprep.subr.mxu1 %v933_v59 }
  0x1e   :  { %846 = vmatpush3.msra.mxu0 %v711_v45  ;;  %864 = vmatpush3.msra.mxu1 %v485_v62 }
  0x1f   :  { %847 = vmatprep.subr.mxu0 %v710_v49  ;;  %865 = vmatprep.subr.mxu1 %v933_v59 }
  0x20   :  { %848 = vmatpush3.msra.mxu0 %v710_v49  ;;  %866 = vmatpush3.msra.mxu1 %v484_v63 }
  0x21   :  { %849 = vmatprep.subr.mxu0 %v709_v50  ;;  %867 = vmatprep.subr.mxu1 %v933_v59 }
  0x22   :  { %850 = vmatpush3.msra.mxu0 %v709_v50  ;;  %868 = vmatpush3.msra.mxu1 %v483_v0 }
  0x23   :  { %851 = vmatprep.subr.mxu0 %v708_v54  ;;  %869 = vmatprep.subr.mxu1 %v933_v59 }
  0x24   :  { %852 = vmatpush3.msra.mxu0 %v708_v54  ;;  %870 = vmatpush3.msra.mxu1 %v482_v1 }
  0x25   :  { %854 = vmatmul.mubr.msk.f32.vlgmr.msra.gmra.mxu0 %vm122_vm2, %v339_v55  ;;  %894 = vmatprep.subr.mxu0 %v933_v59 }
  0x26   :  { %856 = vmatprep.mubr.msk.f32.mxu0 %vm122_vm2, %v322_v56  ;;  %895 = vmatpush3.msra.mxu0 %v487_v60 }
  0x27   :  { %896 = vmatprep.subr.mxu0 %v933_v59  ;;  %871 = vmatprep.subr.mxu1 %v933_v59 }
  0x28   :  { %897 = vmatpush3.msra.mxu0 %v486_v61  ;;  %872 = vmatpush3.msra.mxu1 %v481_v2 }
  0x29   :  { %857 = vmatmul.mubr.msk.f32.gmra.mxu0 %vm122_vm2, %v341_v58  ;;  %898 = vmatprep.subr.mxu0 %v933_v59 }
  0x2a   :  { %899 = vmatpush3.msra.mxu0 %v485_v62  ;;  %873 = vmatprep.subr.mxu1 %v933_v59 }
  0x2b   :  { %900 = vmatprep.subr.mxu0 %v933_v59  ;;  %874 = vmatpush3.msra.mxu1 %v480_v3 }
  0x2c   :  { %901 = vmatpush3.msra.mxu0 %v484_v63  ;;  %875 = vmatprep.subr.mxu1 %v933_v59 }
  0x2d   :  { %902 = vmatprep.subr.mxu0 %v933_v59  ;;  %876 = vmatpush3.msra.mxu1 %v479_v4 }
  0x2e   :  { %903 = vmatpush3.msra.mxu0 %v483_v0  ;;  %877 = vmatprep.subr.mxu1 %v933_v59 }
  0x2f   :  { %904 = vmatprep.subr.mxu0 %v933_v59  ;;  %878 = vmatpush3.msra.mxu1 %v478_v5 }
  0x30   :  { %905 = vmatpush3.msra.mxu0 %v482_v1  ;;  %879 = vmatprep.subr.mxu1 %v933_v59 }
  0x31   :  { %906 = vmatprep.subr.mxu0 %v933_v59  ;;  %880 = vmatpush3.msra.mxu1 %v477_v6 }
  0x32   :  { %907 = vmatpush3.msra.mxu0 %v481_v2  ;;  %881 = vmatprep.subr.mxu1 %v933_v59 }
  0x33   :  { %908 = vmatprep.subr.mxu0 %v933_v59  ;;  %882 = vmatpush3.msra.mxu1 %v476_v8 }
  0x34   :  { %909 = vmatpush3.msra.mxu0 %v480_v3  ;;  %883 = vmatprep.subr.mxu1 %v933_v59 }
  0x35   :  { %910 = vmatprep.subr.mxu0 %v933_v59  ;;  %884 = vmatpush3.msra.mxu1 %v475_v9 }
  0x36   :  { %911 = vmatpush3.msra.mxu0 %v479_v4  ;;  %885 = vmatprep.subr.mxu1 %v933_v59 }
  0x37   :  { %912 = vmatprep.subr.mxu0 %v933_v59  ;;  %886 = vmatpush3.msra.mxu1 %v474_v10 }
  0x38   :  { %913 = vmatpush3.msra.mxu0 %v478_v5  ;;  %887 = vmatprep.subr.mxu1 %v933_v59 }
  0x39   :  { %914 = vmatprep.subr.mxu0 %v933_v59  ;;  %888 = vmatpush3.msra.mxu1 %v473_v11 }
  0x3a   :  { %915 = vmatpush3.msra.mxu0 %v477_v6  ;;  %891 = vmatprep.mubr.msk.f32.mxu1 %vm934_vm7, %v933_v59 }
  0x3b   :  { %916 = vmatprep.subr.mxu0 %v933_v59  ;;  %889 = vmatprep.subr.mxu1 %v933_v59 }
  0x3c   :  { %917 = vmatpush3.msra.mxu0 %v476_v8  ;;  %890 = vmatpush3.msra.mxu1 %v472_v12 }
  0x3d   :  { %918 = vmatprep.subr.mxu0 %v933_v59  ;;  %926 = vmatprep.mubr.msk.f32.mxu0 %vm934_vm7, %v933_v59 }
  0x3e   :  { %919 = vmatpush3.msra.mxu0 %v475_v9  ;;  %v721_v9 = vld [vmem:[%s1230_s3] ss:$0 sm:$0xff] }
  0x3f   :  { %920 = vmatprep.subr.mxu0 %v933_v59 }
  0x40   :  { %921 = vmatpush3.msra.mxu0 %v474_v10 }
  0x41   :  { %922 = vmatprep.subr.mxu0 %v933_v59 }
  0x42   :  { %923 = vmatpush3.msra.mxu0 %v473_v11 }
  0x43   :  { %924 = vmatprep.subr.mxu0 %v933_v59 }
  0x44   :  { %925 = vmatpush3.msra.mxu0 %v472_v12 }
  0xd3   :  { %v811_v13 = vpop.f32.mrf.mxu0 }
  0xd4   :  { %v833_v14 = vpop.f32.mrf.mxu1 }
  0xd5   :  { %v201_v15 = vpop.f32.mrf.mxu0  ;;  %v304_v21 = vadd.f32 %v833_v14, %v811_v13  ;;  %v722_v14 = vld [vmem:[%s1231_s4] ss:$0 sm:$0xff] }
  0xd6   :  { %v298_v17 = vpop.f32.mrf.mxu1 }
  0xd7   :  { %v299_v22 = vadd.f32 %v298_v17, %v201_v15 }
  0xd8   :  { %v836_v18 = vpop.f32.mrf.mxu1 }
  0xd9   :  { %v814_v16 = vpop.f32.mrf.mxu0 }
  0xda   :  { %v308_v23 = vpop.f32.mrf.mxu1  ;;  %v314_v29 = vadd.f32 %v836_v18, %v814_v16 }
  0xdb   :  { %v211_v19 = vpop.f32.mrf.mxu0 }
  0xdc   :  { %v309_v30 = vadd.f32 %v308_v23, %v211_v19 }
  0xe5   :  { %v855_v20 = vpop.f32.mrf.mxu0 }
  0xe6   :  { %v449_v25 = vadd.f32 %v855_v20, %v304_v21 }
  0xe7   :  { %v429_v24 = vpop.f32.mrf.mxu0 }
  0xe8   :  { %v448_v26 = vadd.f32 %v429_v24, %v299_v22  ;;  %v460_v33 = vadd.f32 %v720_v27, %v449_v25 }
  0xe9   :  { %v858_v28 = vpop.f32.mrf.mxu0 }
  0xea   :  { %v459_v31 = vadd.f32 %v720_v27, %v448_v26  ;;  %v451_v34 = vadd.f32 %v858_v28, %v314_v29 }
  0xeb   :  { %v439_v32 = vpop.f32.mrf.mxu0 }
  0xec   :  { %v450_v35 = vadd.f32 %v439_v32, %v309_v30  ;;  %v463_v36 = vadd.f32 %v460_v33, %v459_v31  ;;  %v462_v38 = vadd.f32 %v720_v27, %v451_v34 }
  0xee   :  { %v461_v37 = vadd.f32 %v720_v27, %v450_v35 }
  0xf0   :  { %v464_v39 = vadd.f32 %v463_v36, %v461_v37 }
  0xf2   :  { %v465_v40 = vadd.f32 %v464_v39, %v462_v38 }
  0xf4   :  { %v466_v41 = vrot.slane %v465_v40, 4 }
  0xf6   :  { %v467_v42 = vadd.f32 %v466_v41, %v465_v40 }
  0xf8   :  { %v468_v43 = vrot.slane %v467_v42, 2 }
  0xfa   :  { %v469_v44 = vadd.f32 %v468_v43, %v467_v42 }
  0xfc   :  { %v470_v45 = vrot.slane %v469_v44, 1 }
  0xfe   :  { %v471_v46 = vadd.f32 %v470_v45, %v469_v44 }
 0x100   :  { %892 = vmatmul.mubr.f32.vlgmr.msra.gmra.mxu1 %v471_v46 }
 0x1c0   :  { %v554_v48 = vpop.f32.mrf.mxu1 }
 0x1c1   :  { %v561_v49 = vrot.slane %v554_v48, %v560_v47 }
 0x1c2   :  { %v893_v50 = vpop.f32.mrf.mxu1 }
 0x1c3   :  { %v562_v51 = vsub.f32 %v459_v31, %v561_v49  ;;  %v563_v52 = vsub.f32 %v460_v33, %v561_v49  ;;  %v564_v53 = vsub.f32 %v461_v37, %v561_v49  ;;  %v565_v54 = vsub.f32 %v462_v38, %v561_v49 }
 0x1c5   :  { %v566_v55 = vmul.f32 %v562_v51, %v562_v51  ;;  %v567_v56 = vmul.f32 %v563_v52, %v563_v52  ;;  %v568_v57 = vmul.f32 %v564_v53, %v564_v53  ;;  %v569_v59 = vmul.f32 %v565_v54, %v565_v54 }
 0x1c7   :  { %v570_v58 = vadd.f32 %v567_v56, %v566_v55 }
 0x1c9   :  { %v571_v60 = vadd.f32 %v570_v58, %v568_v57 }
 0x1cb   :  { %v572_v61 = vadd.f32 %v571_v60, %v569_v59 }
 0x1cd   :  { %v573_v62 = vrot.slane %v572_v61, 4 }
 0x1cf   :  { %v574_v63 = vadd.f32 %v573_v62, %v572_v61 }
 0x1d1   :  { %v575_v0 = vrot.slane %v574_v63, 2 }
 0x1d3   :  { %v576_v1 = vadd.f32 %v575_v0, %v574_v63 }
 0x1d5   :  { %v577_v2 = vrot.slane %v576_v1, 1 }
 0x1d7   :  { %v578_v7 = vadd.f32 %v577_v2, %v576_v1 }
 0x1d9   :  { %927 = vmatmul.mubr.f32.vlgmr.msra.gmra.mxu0 %v578_v7 }
 0x299   :  { %v645_v3 = vpop.f32.mrf.mxu0 }
 0x29a   :  { %v646_v4 = vadd.f32 1e-05, %v645_v3 }
 0x29b   :  { %v928_v5 = vpop.f32.mrf.mxu0 }
 0x29c   :  { %931 = vrsqrt.f32 %v646_v4 }
 0x2a9   :  { %v932_v6 = vpop.eup %931 }
 0x2aa   :  { %v653_v8 = vrot.slane %v932_v6, %v560_v47 }
 0x2ac   :  { %v654_v10 = vmul.f32 %v653_v8, %v562_v51  ;;  %v655_v11 = vmul.f32 %v653_v8, %v563_v52  ;;  %v656_v12 = vmul.f32 %v653_v8, %v564_v53  ;;  %v657_v13 = vmul.f32 %v653_v8, %v565_v54 }
 0x2ae   :  { %v665_v15 = vmul.f32 %v721_v9, %v654_v10  ;;  %v666_v16 = vmul.f32 %v721_v9, %v655_v11  ;;  %v667_v17 = vmul.f32 %v721_v9, %v656_v12  ;;  %v668_v18 = vmul.f32 %v721_v9, %v657_v13 }
 0x2b0   :  { %v676_v19 = vadd.f32 %v722_v14, %v665_v15  ;;  %v677_v20 = vadd.f32 %v722_v14, %v666_v16  ;;  %v678_v21 = vadd.f32 %v722_v14, %v667_v17  ;;  %v679_v22 = vadd.f32 %v722_v14, %v668_v18 }
 0x2b2   :  { %v680_v23 = vmax.f32 %v676_v19, 0.0  ;;  %v681_v24 = vmax.f32 %v677_v20, 0.0  ;;  %v682_v25 = vmax.f32 %v678_v21, 0.0  ;;  %v683_v26 = vmax.f32 %v679_v22, 0.0 }
 0x2b4   :  { %684 = vst [vmem:[%s1232_s6] sm:$0xff] %v680_v23  ;;  %685 = vst [vmem:[%s1232_s6 + $0x8] sm:$0xff] %v681_v24 }
 0x2b5   :  { %686 = vst [vmem:[%s1232_s6 + $0x10] sm:$0xff] %v682_v25  ;;  %687 = vst [vmem:[%s1232_s6 + $0x18] sm:$0xff] %v683_v26 }

</bundles_post_ra>
